<compile_context>
chip_gen: v6e
topology: v6e:2x2x1
jax: 0.10.0
libtpu: 0.0.40
codegen_flags: <defaults>
</compile_context>

<pallas_src>
import functools

import numpy as np

import jax
import jax.numpy as jnp
from jax import lax
from jax.experimental import pallas as pl
from jax.experimental.pallas import tpu as pltpu


# ----------------------------------------------------------------------------
# Per-generation VMEM budgeting (v5e/v6e: 128 MiB physical, v7x: 64 MiB)
# ----------------------------------------------------------------------------
def _vmem_budgets():
    phys = 64 * 1024 * 1024
    try:
        info = pltpu.get_tpu_info()
        phys = int(getattr(info, "vmem_capacity_bytes", phys))
    except Exception:
        pass
    vmem_limit = min(int(phys * 0.70), 96 * 1024 * 1024)   # ~45 MiB on v7x, ~90 MiB v5e/v6e
    tile_budget = min(int(phys * 0.20), 24 * 1024 * 1024)   # ~13 MiB on v7x, 24 MiB v5e/v6e
    return vmem_limit, tile_budget


_VMEM_LIMIT_BYTES, _TILE_BUDGET = _vmem_budgets()


def _choose_rows(rows, per_row_bytes, resident_bytes=0, budget=None, cap=1024, min_tiles=1):
    """Largest multiple-of-8 row tile whose working set (incl. residents) fits the budget."""
    if rows <= 8:
        return rows
    budget = _TILE_BUDGET if budget is None else budget
    avail = max(budget - int(resident_bytes), 1 << 20)
    t = min(rows, cap, max(8, avail // max(int(per_row_bytes), 1)))
    if min_tiles > 1 and rows >= 8 * min_tiles:
        t = min(t, -(-rows // min_tiles))          # >=2 grid steps -> both v7x TCs busy
    if t >= rows:
        return rows                                # single full block, always legal
    return max(8, (t // 8) * 8)


def _precise_reciprocal(x):
    """EUP approximate reciprocal + one Newton step (rel err ~1e-7, frees VALU slots)."""
    r = pl.reciprocal(x, approx=True)
    return r * (2.0 - x * r)


# ----------------------------------------------------------------------------
# Kernel 1: fused (all heads) Q/K/V projection
# ----------------------------------------------------------------------------
def _qkv_kernel(x_ref, wq_ref, wk_ref, wv_ref, q_ref, k_ref, v_ref):
    x = x_ref[...]                                   # native dtype on the MXU
    q_ref[...] = jnp.dot(x, wq_ref[...], preferred_element_type=jnp.float32).astype(q_ref.dtype)
    k_ref[...] = jnp.dot(x, wk_ref[...], preferred_element_type=jnp.float32).astype(k_ref.dtype)
    v_ref[...] = jnp.dot(x, wv_ref[...], preferred_element_type=jnp.float32).astype(v_ref.dtype)


def _qkv_proj(inp, wq_cat, wk_cat, wv_cat):
    T, d_model = inp.shape
    nqk = wq_cat.shape[-1]                           # n_head * d_k
    nv = wv_cat.shape[-1]                            # n_head * d_v
    isz = inp.dtype.itemsize

    per_row = 2 * isz * (d_model + 2 * nqk + nv) + 4 * (2 * nqk + nv)   # streamed + f32 acc
    resident = isz * d_model * (2 * nqk + nv)                            # resident weights
    tm = _choose_rows(T, per_row, resident, min_tiles=2)
    nt = pl.cdiv(T, tm)

    return pl.pallas_call(
        _qkv_kernel,
        out_shape=(jax.ShapeDtypeStruct((T, nqk), inp.dtype),
                   jax.ShapeDtypeStruct((T, nqk), inp.dtype),
                   jax.ShapeDtypeStruct((T, nv), inp.dtype)),
        grid_spec=pltpu.PrefetchScalarGridSpec(
            num_scalar_prefetch=0,
            grid=(nt,),
            in_specs=[
                pl.BlockSpec((tm, d_model), lambda i: (i, 0)),
                pl.BlockSpec((d_model, nqk), lambda i: (0, 0)),   # resident weights
                pl.BlockSpec((d_model, nqk), lambda i: (0, 0)),
                pl.BlockSpec((d_model, nv), lambda i: (0, 0)),
            ],
            out_specs=[
                pl.BlockSpec((tm, nqk), lambda i: (i, 0)),
                pl.BlockSpec((tm, nqk), lambda i: (i, 0)),
                pl.BlockSpec((tm, nv), lambda i: (i, 0)),
            ],
        ),
        compiler_params=pltpu.CompilerParams(
            dimension_semantics=("parallel",),
            vmem_limit_bytes=_VMEM_LIMIT_BYTES,
        ),
    )(inp, wq_cat, wk_cat, wv_cat)


# ----------------------------------------------------------------------------
# Kernel 2: padded scaled-dot-product attention, query-tiled, in-kernel key mask
# ----------------------------------------------------------------------------
def _attention_kernel(len_ref, q_ref, k_ref, v_ref, o_ref, attn_ref, *, inv_temper):
    b = pl.program_id(0)
    key_len = len_ref[b]                                        # SMEM scalar (valid keys)

    # fold 1/sqrt(d_model) into Q ([tq, d_k] mults instead of [tq, L])
    q = q_ref[0] * jnp.asarray(inv_temper, dtype=q_ref.dtype)
    s = lax.dot_general(q, k_ref[0], (((1,), (1,)), ((), ())),
                        preferred_element_type=jnp.float32)     # [tq, L] f32

    col = lax.broadcasted_iota(jnp.int32, s.shape, 1)
    s = jnp.where(col < key_len, s, -1e30)                      # in-kernel key-validity mask

    m = jnp.max(s, axis=-1, keepdims=True)
    p = jnp.exp(s - m)
    denom = jnp.sum(p, axis=-1, keepdims=True)
    attn = p * _precise_reciprocal(denom)

    attn_ref[0] = attn.astype(attn_ref.dtype)
    o_ref[0] = jnp.dot(attn.astype(v_ref.dtype), v_ref[0],
                       preferred_element_type=jnp.float32).astype(o_ref.dtype)


def _attention(q_p, k_p, v_p, key_len, d_model):
    B, L, d_k = q_p.shape
    d_v = v_p.shape[-1]
    isz = q_p.dtype.itemsize

    # streamed per query row: Q in, O out, attn out (f32) — double-buffered — plus
    # two f32 [tq, L] intermediates (scores / probs); resident: double-buffered K/V.
    per_row = 2 * (isz * (d_k + d_v) + 4 * L) + 2 * 4 * L
    resident = 2 * isz * L * (d_k + d_v)
    tq = _choose_rows(L, per_row, resident, cap=512)
    nq = pl.cdiv(L, tq)

    kernel = functools.partial(_attention_kernel,
                               inv_temper=float(1.0 / (d_model ** 0.5)))
    return pl.pallas_call(
        kernel,
        out_shape=(jax.ShapeDtypeStruct((B, L, d_v), q_p.dtype),
                   jax.ShapeDtypeStruct((B, L, L), jnp.float32)),
        grid_spec=pltpu.PrefetchScalarGridSpec(
            num_scalar_prefetch=1,                              # key_len -> SMEM
            grid=(B, nq),
            in_specs=[
                pl.BlockSpec((1, tq, d_k), lambda b, qi, kl: (b, qi, 0)),
                pl.BlockSpec((1, L, d_k), lambda b, qi, kl: (b, 0, 0)),   # K resident per b
                pl.BlockSpec((1, L, d_v), lambda b, qi, kl: (b, 0, 0)),   # V resident per b
            ],
            out_specs=[
                pl.BlockSpec((1, tq, d_v), lambda b, qi, kl: (b, qi, 0)),
                pl.BlockSpec((1, tq, L), lambda b, qi, kl: (b, qi, 0)),
            ],
        ),
        compiler_params=pltpu.CompilerParams(
            dimension_semantics=("parallel", "parallel"),
            vmem_limit_bytes=_VMEM_LIMIT_BYTES,
        ),
    )(key_len, q_p, k_p, v_p)


# ----------------------------------------------------------------------------
# Kernel 3: fused combine_v projection + residual add + LayerNormalization
# (torch.std semantics: unbiased variance, eps added to sigma)
# ----------------------------------------------------------------------------
def _proj_res_ln_kernel(x_ref, w_ref, r_ref, a_ref, b_ref, o_ref, *, eps, d_model):
    y = jnp.dot(x_ref[...], w_ref[...], preferred_element_type=jnp.float32)
    y = y + r_ref[...].astype(jnp.float32)                      # residual add

    mu = jnp.mean(y, axis=-1, keepdims=True)
    diff = y - mu
    var = jnp.sum(diff * diff, axis=-1, keepdims=True) * (1.0 / (d_model - 1))
    sigma = jnp.sqrt(var)
    out = diff * _precise_reciprocal(sigma + eps)
    out = out * a_ref[...].astype(jnp.float32) + b_ref[...].astype(jnp.float32)
    o_ref[...] = out.astype(o_ref.dtype)


def _proj_residual_layernorm(combined, w_proj, residual, a_2, b_2, eps):
    T, d_in = combined.shape
    d_model = w_proj.shape[-1]
    isz = combined.dtype.itemsize

    per_row = 2 * isz * (d_in + 2 * d_model) + 2 * 4 * d_model   # streamed + f32 y/diff
    resident = isz * (d_in * d_model + 2 * d_model)              # weight + affine params
    tm = _choose_rows(T, per_row, resident, min_tiles=2)
    nt = pl.cdiv(T, tm)                                          # boundary blocks masked

    kernel = functools.partial(_proj_res_ln_kernel, eps=float(eps), d_model=d_model)
    return pl.pallas_call(
        kernel,
        out_shape=jax.ShapeDtypeStruct((T, d_model), residual.dtype),
        grid_spec=pltpu.PrefetchScalarGridSpec(
            num_scalar_prefetch=0,
            grid=(nt,),
            in_specs=[
                pl.BlockSpec((tm, d_in), lambda i: (i, 0)),
                pl.BlockSpec((d_in, d_model), lambda i: (0, 0)),   # resident weight
                pl.BlockSpec((tm, d_model), lambda i: (i, 0)),
                pl.BlockSpec((1, d_model), lambda i: (0, 0)),
                pl.BlockSpec((1, d_model), lambda i: (0, 0)),
            ],
            out_specs=pl.BlockSpec((tm, d_model), lambda i: (i, 0)),
        ),
        compiler_params=pltpu.CompilerParams(
            dimension_semantics=("parallel",),
            vmem_limit_bytes=_VMEM_LIMIT_BYTES,
        ),
    )(combined, w_proj, residual, a_2, b_2)


# ----------------------------------------------------------------------------
# Host-side batch bookkeeping (equivalent of the PyTorch batch_idxs object)
# ----------------------------------------------------------------------------
class BatchIndices:
    def __init__(self, lengths):
        self.lengths = np.asarray(lengths, dtype=np.int64)
        self.batch_size = int(len(self.lengths))
        self.boundaries_np = np.concatenate(
            [np.zeros(1, dtype=np.int64), np.cumsum(self.lengths)])
        self.max_len = int(self.lengths.max())


def _pad_maps(batch_idxs):
    mb, L = batch_idxs.batch_size, batch_idxs.max_len
    gather = np.zeros((mb, L), dtype=np.int32)
    valid = np.zeros((mb, L), dtype=bool)
    for i, (s, e) in enumerate(zip(batch_idxs.boundaries_np[:-1],
                                   batch_idxs.boundaries_np[1:])):
        n = int(e - s)
        gather[i, :n] = np.arange(s, e, dtype=np.int32)
        valid[i, :n] = True
    return gather, valid


# ----------------------------------------------------------------------------
# Full MultiHeadAttention forward (eval mode, non-partitioned)
# ----------------------------------------------------------------------------
def multi_head_attention_forward(inp, params, batch_idxs, *, d_model, n_head, eps=1e-3):
    w_qs, w_ks, w_vs = params["w_qs"], params["w_ks"], params["w_vs"]
    w_proj, a_2, b_2 = params["w_proj"], params["a_2"], params["b_2"]

    d_k = w_qs.shape[-1]
    d_v = w_vs.shape[-1]
    mb, L = batch_idxs.batch_size, batch_idxs.max_len

    # ---- split_qkv_packed: one fused wide matmul over all heads (Pallas) ----
    wq_cat = jnp.transpose(w_qs, (1, 0, 2)).reshape(d_model, n_head * d_k)
    wk_cat = jnp.transpose(w_ks, (1, 0, 2)).reshape(d_model, n_head * d_k)
    wv_cat = jnp.transpose(w_vs, (1, 0, 2)).reshape(d_model, n_head * d_v)
    q_all, k_all, v_all = _qkv_proj(inp, wq_cat, wk_cat, wv_cat)   # [T, n_head*d]

    # ---- pad_and_rearrange: packed -> [n_head*mb, L, d]; padded rows are harmless
    # copies of packed row 0 (neutralised by the in-kernel key mask, no vmask multiply,
    # no bias tensor). TODO(synk): fuse this gather into the attention kernel.
    gather, valid = _pad_maps(batch_idxs)
    gflat = jnp.asarray(gather.reshape(-1))

    def to_padded(x_all, d):
        xp = jnp.take(x_all, gflat, axis=0).reshape(mb, L, n_head, d)
        return jnp.transpose(xp, (2, 0, 1, 3)).reshape(n_head * mb, L, d)

    q_p, k_p, v_p = to_padded(q_all, d_k), to_padded(k_all, d_k), to_padded(v_all, d_v)

    # per-attention-row valid key counts (scalar-prefetched into SMEM by the kernel)
    key_len = jnp.asarray(np.tile(batch_idxs.lengths.astype(np.int32), n_head))

    # ---- ScaledDotProductAttention (Pallas, query-tiled, in-kernel mask) ----
    out_p, attns_padded = _attention(q_p, k_p, v_p, key_len, d_model)
    # NOTE: at fully-padded query rows the reference yields NaN; we return finite
    # values there. Those rows are never consumed downstream.

    # ---- output_mask + combine heads -> packed [T, n_head*d_v] ----
    outm = jnp.transpose(out_p.reshape(n_head, mb, L, d_v), (1, 2, 0, 3))
    outm = outm.reshape(mb * L, n_head * d_v)
    sel = jnp.asarray(np.nonzero(valid.reshape(-1))[0].astype(np.int32))
    outputs = jnp.take(outm, sel, axis=0)                          # [T, n_head*d_v]

    # ---- fused proj + residual + LayerNorm (dropouts are identity in eval mode) ----
    ln_out = _proj_residual_layernorm(outputs, w_proj, inp, a_2, b_2, eps)
    return ln_out, attns_padded


# ----------------------------------------------------------------------------
# Pure-JAX reference (mirrors the PyTorch module forward, eval mode)
# ----------------------------------------------------------------------------
def _reference_forward(inp, params, batch_idxs, *, d_model, n_head, eps=1e-3):
    w_qs, w_ks, w_vs = params["w_qs"], params["w_ks"], params["w_vs"]
    w_proj, a_2, b_2 = params["w_proj"], params["a_2"], params["b_2"]
    hp = jax.lax.Precision.HIGHEST

    T = inp.shape[0]
    d_k = w_qs.shape[-1]
    d_v = w_vs.shape[-1]
    mb, L = batch_idxs.batch_size, batch_idxs.max_len

    q_s = jnp.einsum('td,hdk->htk', inp, w_qs, precision=hp)
    k_s = jnp.einsum('td,hdk->htk', inp, w_ks, precision=hp)
    v_s = jnp.einsum('td,hdk->htk', inp, w_vs, precision=hp)

    gather, valid = _pad_maps(batch_idxs)
    gflat = gather.reshape(-1)
    vm = jnp.asarray(valid, jnp.float32)[None, :, :, None]

    def pad(x, d):
        return (jnp.take(x, gflat, axis=1).reshape(n_head, mb, L, d) * vm
                ).reshape(n_head * mb, L, d)

    q_p, k_p, v_p = pad(q_s, d_k), pad(k_s, d_k), pad(v_s, d_v)

    s = jnp.einsum('bqd,bkd->bqk', q_p, k_p, precision=hp) / (d_model ** 0.5)
    key_valid = jnp.asarray(np.tile(valid, (n_head, 1)), bool)              # [B, L]
    s = jnp.where(key_valid[:, None, :], s, -jnp.inf)
    attn = jax.nn.softmax(s, axis=-1)
    out_p = jnp.einsum('bqk,bkd->bqd', attn, v_p, precision=hp)

    sel = np.nonzero(np.tile(valid, (n_head, 1)).reshape(-1))[0]
    outputs = out_p.reshape(n_head * mb * L, d_v)[sel]
    outputs = outputs.reshape(n_head, T, d_v).transpose(1, 0, 2).reshape(T, n_head * d_v)

    y = jnp.einsum('tc,cd->td', outputs, w_proj, precision=hp) + inp
    mu = jnp.mean(y, axis=-1, keepdims=True)
    sigma = jnp.std(y, axis=-1, keepdims=True, ddof=1)
    ln = (y - mu) / (sigma + eps) * a_2 + b_2
    return ln, attn


if __name__ == "__main__":
    key = jax.random.PRNGKey(0)
    n_head, d_model, d_k, d_v = 4, 32, 16, 16
    lengths = [6, 8]                          # two packed "sentences", max_len=8
    batch_idxs = BatchIndices(lengths)
    T = int(sum(lengths))

    keys = jax.random.split(key, 7)
    inp = jax.random.normal(keys[0], (T, d_model), jnp.float32)

    def xavier(k, shape):
        fan_in, fan_out = shape[-2], shape[-1]
        std = (2.0 / (fan_in + fan_out)) ** 0.5
        return std * jax.random.normal(k, shape, jnp.float32)

    params = dict(
        w_qs=xavier(keys[1], (n_head, d_model, d_k)),
        w_ks=xavier(keys[2], (n_head, d_model, d_k)),
        w_vs=xavier(keys[3], (n_head, d_model, d_v)),
        # proj = nn.Linear(n_head*d_v, d_model, bias=False); stored as weight.T
        w_proj=xavier(keys[4], (n_head * d_v, d_model)),
        # LayerNormalization params (ones/zeros), perturbed so the affine path is exercised
        a_2=(jnp.ones((1, d_model), jnp.float32)
             + 0.01 * jax.random.normal(keys[5], (1, d_model))),
        b_2=(jnp.zeros((1, d_model), jnp.float32)
             + 0.01 * jax.random.normal(keys[6], (1, d_model))),
    )

    ln_out, attns = multi_head_attention_forward(
        inp, params, batch_idxs, d_model=d_model, n_head=n_head, eps=1e-3)
    ln_out = jax.block_until_ready(ln_out)
    attns = jax.block_until_ready(attns)

    ref_ln, ref_attn = _reference_forward(
        inp, params, batch_idxs, d_model=d_model, n_head=n_head, eps=1e-3)

    assert ln_out.shape == (T, d_model) and ln_out.dtype == inp.dtype
    assert attns.shape == (n_head * batch_idxs.batch_size,
                           batch_idxs.max_len, batch_idxs.max_len)

    # Compare attention only at valid query rows (PyTorch yields NaN on fully-masked
    # rows; those rows are never consumed downstream).
    _, valid = _pad_maps(batch_idxs)
    valid_q = np.tile(valid, (n_head, 1))
    attns_np, ref_attn_np = np.asarray(attns), np.asarray(ref_attn)
    err_attn = float(np.max(np.abs(attns_np[valid_q] - ref_attn_np[valid_q])))
    err_out = float(np.max(np.abs(np.asarray(ln_out) - np.asarray(ref_ln))))
    assert err_attn < 1e-4, err_attn
    assert err_out < 1e-4, err_out

    print("KERNEL_OK")
</pallas_src>

<mosaic_0001>
module attributes {stable_mosaic.version = 11 : i64} {
  func.func @_qkv_kernel(%arg0: i32, %arg1: memref<14x32xf32, #tpu.memory_space<vmem>>, %arg2: memref<32x64xf32, #tpu.memory_space<vmem>>, %arg3: memref<32x64xf32, #tpu.memory_space<vmem>>, %arg4: memref<32x64xf32, #tpu.memory_space<vmem>>, %arg5: memref<14x64xf32, #tpu.memory_space<vmem>>, %arg6: memref<14x64xf32, #tpu.memory_space<vmem>>, %arg7: memref<14x64xf32, #tpu.memory_space<vmem>>) attributes {dimension_semantics = [#tpu.dimension_semantics<parallel>], iteration_bounds = array<i64: 1>, scalar_prefetch = 0 : i64, scratch_operands = 0 : i64, tpu.core_type = #tpu.core_type<tc>, window_params = [{transform_indices = @transform_0, window_bounds = array<i64: 14, 32>}, {pipeline_mode = #tpu.pipeline_mode<synchronous>, transform_indices = @transform_1, window_bounds = array<i64: 32, 64>}, {pipeline_mode = #tpu.pipeline_mode<synchronous>, transform_indices = @transform_2, window_bounds = array<i64: 32, 64>}, {pipeline_mode = #tpu.pipeline_mode<synchronous>, transform_indices = @transform_3, window_bounds = array<i64: 32, 64>}, {transform_indices = @transform_4, window_bounds = array<i64: 14, 64>}, {transform_indices = @transform_5, window_bounds = array<i64: 14, 64>}, {transform_indices = @transform_6, window_bounds = array<i64: 14, 64>}]} {
    %c0 = arith.constant 0 : index
    %c0_0 = arith.constant 0 : index
    %0 = vector.load %arg1[%c0, %c0_0] : memref<14x32xf32, #tpu.memory_space<vmem>>, vector<14x32xf32>
    %c0_1 = arith.constant 0 : index
    %c0_2 = arith.constant 0 : index
    %1 = vector.load %arg2[%c0_1, %c0_2] : memref<32x64xf32, #tpu.memory_space<vmem>>, vector<32x64xf32>
    %cst = arith.constant dense<0.000000e+00> : vector<14x64xf32>
    %2 = tpu.matmul %0, %1, %cst {dimension_numbers = #tpu.dot_dimension_numbers<[1], [0], [0], [1], [0, 0, 1, 1], [], []>} : vector<14x32xf32>, vector<32x64xf32>, vector<14x64xf32> -> vector<14x64xf32>
    %c0_3 = arith.constant 0 : index
    %c0_4 = arith.constant 0 : index
    %3 = vector.load %arg5[%c0_3, %c0_4] : memref<14x64xf32, #tpu.memory_space<vmem>>, vector<14x64xf32>
    tpu.vector_store %arg5[%c0_3, %c0_4], %2 {strides = array<i32>} : memref<14x64xf32, #tpu.memory_space<vmem>>, vector<14x64xf32>,
    %c0_5 = arith.constant 0 : index
    %c0_6 = arith.constant 0 : index
    %4 = vector.load %arg3[%c0_5, %c0_6] : memref<32x64xf32, #tpu.memory_space<vmem>>, vector<32x64xf32>
    %cst_7 = arith.constant dense<0.000000e+00> : vector<14x64xf32>
    %5 = tpu.matmul %0, %4, %cst_7 {dimension_numbers = #tpu.dot_dimension_numbers<[1], [0], [0], [1], [0, 0, 1, 1], [], []>} : vector<14x32xf32>, vector<32x64xf32>, vector<14x64xf32> -> vector<14x64xf32>
    %c0_8 = arith.constant 0 : index
    %c0_9 = arith.constant 0 : index
    %6 = vector.load %arg6[%c0_8, %c0_9] : memref<14x64xf32, #tpu.memory_space<vmem>>, vector<14x64xf32>
    tpu.vector_store %arg6[%c0_8, %c0_9], %5 {strides = array<i32>} : memref<14x64xf32, #tpu.memory_space<vmem>>, vector<14x64xf32>,
    %c0_10 = arith.constant 0 : index
    %c0_11 = arith.constant 0 : index
    %7 = vector.load %arg4[%c0_10, %c0_11] : memref<32x64xf32, #tpu.memory_space<vmem>>, vector<32x64xf32>
    %cst_12 = arith.constant dense<0.000000e+00> : vector<14x64xf32>
    %8 = tpu.matmul %0, %7, %cst_12 {dimension_numbers = #tpu.dot_dimension_numbers<[1], [0], [0], [1], [0, 0, 1, 1], [], []>} : vector<14x32xf32>, vector<32x64xf32>, vector<14x64xf32> -> vector<14x64xf32>
    %c0_13 = arith.constant 0 : index
    %c0_14 = arith.constant 0 : index
    %9 = vector.load %arg7[%c0_13, %c0_14] : memref<14x64xf32, #tpu.memory_space<vmem>>, vector<14x64xf32>
    tpu.vector_store %arg7[%c0_13, %c0_14], %8 {strides = array<i32>} : memref<14x64xf32, #tpu.memory_space<vmem>>, vector<14x64xf32>,
    return
  }
  func.func @transform_0(%arg0: i32) -> (i32, i32) {
    %c0_i32 = arith.constant 0 : i32
    %c0_i32_0 = arith.constant 0 : i32
    return %arg0, %c0_i32 : i32, i32
  }
  func.func @transform_1(%arg0: i32) -> (i32, i32) {
    %c0_i32 = arith.constant 0 : i32
    %c0_i32_0 = arith.constant 0 : i32
    %c0_i32_1 = arith.constant 0 : i32
    return %c0_i32, %c0_i32_0 : i32, i32
  }
  func.func @transform_2(%arg0: i32) -> (i32, i32) {
    %c0_i32 = arith.constant 0 : i32
    %c0_i32_0 = arith.constant 0 : i32
    %c0_i32_1 = arith.constant 0 : i32
    return %c0_i32, %c0_i32_0 : i32, i32
  }
  func.func @transform_3(%arg0: i32) -> (i32, i32) {
    %c0_i32 = arith.constant 0 : i32
    %c0_i32_0 = arith.constant 0 : i32
    %c0_i32_1 = arith.constant 0 : i32
    return %c0_i32, %c0_i32_0 : i32, i32
  }
  func.func @transform_4(%arg0: i32) -> (i32, i32) {
    %c0_i32 = arith.constant 0 : i32
    %c0_i32_0 = arith.constant 0 : i32
    return %arg0, %c0_i32 : i32, i32
  }
  func.func @transform_5(%arg0: i32) -> (i32, i32) {
    %c0_i32 = arith.constant 0 : i32
    %c0_i32_0 = arith.constant 0 : i32
    return %arg0, %c0_i32 : i32, i32
  }
  func.func @transform_6(%arg0: i32) -> (i32, i32) {
    %c0_i32 = arith.constant 0 : i32
    %c0_i32_0 = arith.constant 0 : i32
    return %arg0, %c0_i32 : i32, i32
  }
}

</mosaic_0001>

<bundles_post_ra>
// kernel: tpu_custom_call.1
= control target key start
LH: loop header
LB: loop body
LE: loop exit
PB: predicated region body
PF: predicated region fallthrough
CT: control target
= control target key end

     0   :  { %12 = vsyncpa [#allocation3], 0  ;;  %s695_s0 = inlined_call_operand.hbm [shape: f32[14,32], index: 0, kind: input, shape index: {}]   ;;  %s696_s1 = inlined_call_operand.hbm [shape: f32[32,64], index: 1, kind: input, shape index: {}]   ;;  %s697_s2 = inlined_call_operand.hbm [shape: f32[32,64], index: 2, kind: input, shape index: {}]   ;;  %s698_s3 = inlined_call_operand.hbm [shape: f32[32,64], index: 3, kind: input, shape index: {}]   ;;  %s699_s4 = inlined_call_operand.hbm [shape: f32[14,64], index: 4, kind: output, shape index: {0}]   ;;  %s700_s5 = inlined_call_operand.hbm [shape: f32[14,64], index: 5, kind: output, shape index: {1}]   ;;  %s701_s6 = inlined_call_operand.hbm [shape: f32[14,64], index: 6, kind: output, shape index: {2}]  }
   0x1   :  { %13 = vsyncpa [#allocation6], 0 }
   0x2   :  { %14 = vsyncpa [#allocation9], 0 }
   0x3   :  { %15 = vsyncpa [#allocation4], 0 }
   0x4   :  { %16 = vsyncpa [#allocation12], 0  ;;  %s597_s21 = smov [#allocation5]   ;;  %s598_s23 = smov [#allocation2]  }
   0x5   :  { %s34_s22 = sshll.u32 %s597_s21, 4  ;;  %s22_s24 = sshll.u32 %s598_s23, 4  ;;  %s35_s22 = int_to_ptr.vmem [resolvable:$true] %s34_s22  ;;  %s23_s24 = int_to_ptr.vmem [resolvable:$true] %s22_s24 }
   0x6   :  { %s455_s25 = scalar_lea.vmem %s35_s22, 512  ;;  %p460_p1 = scmp.lt.s32.totalorder %s35_s22, %s35_s22 }
   0x7   :  { %p456_p0 = scmp.ne.s32.totalorder %s35_s22, %s455_s25  ;;  %p461_p2 = scmp.lt.s32.totalorder %s455_s25, %s455_s25 }
   0x9   :  { %p462_p3 = por %p461_p2, %p460_p1 }
   0xb   :  { %p463_p4 = pnand %p462_p3, %p456_p0 }
   0xd   :  { %466 = shalt.err (!%p463_p4)
}
   0xe   :  { %s599_s26 = smov 128   ;;  %s600_s27 = smov 8  }
   0xf   :  { %40 = dma.hbm_to_vmem [thread:$0]  %s696_s1, 512, %s35_s22, [#allocation6], %s599_s26, %s599_s26, %s600_s27  }
  0x10   :  { %s475_s30 = scalar_lea.vmem %s23_s24, 256  ;;  %p480_p6 = scmp.lt.s32.totalorder %s23_s24, %s23_s24 }
  0x11   :  { %p476_p5 = scmp.ne.s32.totalorder %s23_s24, %s475_s30  ;;  %p481_p7 = scmp.lt.s32.totalorder %s475_s30, %s475_s30 }
  0x13   :  { %p482_p8 = por %p481_p7, %p480_p6 }
  0x15   :  { %p483_p9 = pnand %p482_p8, %p476_p5 }
  0x17   :  { %486 = shalt.err (!%p483_p9)
}
  0x18   :  { %28 = dma.hbm_to_vmem [thread:$0]  %s695_s0, 256, %s23_s24, [#allocation3], %s599_s26, %s599_s26, %s600_s27  }
  0x19   :  { %s601_s9 = smov [#allocation7]   ;;  %s602_s11 = smov [#allocation8]  }
  0x1a   :  { %s46_s10 = sshll.u32 %s601_s9, 4  ;;  %s58_s12 = sshll.u32 %s602_s11, 4  ;;  %s47_s10 = int_to_ptr.vmem [resolvable:$true] %s46_s10  ;;  %s59_s12 = int_to_ptr.vmem [resolvable:$true] %s58_s12 }
  0x1b   :  { %s495_s1 = scalar_lea.vmem %s47_s10, 512  ;;  %p500_p11 = scmp.lt.s32.totalorder %s47_s10, %s47_s10 }
  0x1c   :  { %p496_p10 = scmp.ne.s32.totalorder %s47_s10, %s495_s1  ;;  %p501_p12 = scmp.lt.s32.totalorder %s495_s1, %s495_s1 }
  0x1e   :  { %p502_p13 = por %p501_p12, %p500_p11 }
  0x20   :  { %p503_p0 = pnand %p502_p13, %p496_p10 }
  0x22   :  { %506 = shalt.err (!%p503_p0)
}
  0x23   :  { %52 = dma.hbm_to_vmem [thread:$0]  %s697_s2, 512, %s47_s10, [#allocation6], %s599_s26, %s599_s26, %s600_s27  }
  0x24   :  { %s515_s0 = scalar_lea.vmem %s59_s12, 512  ;;  %p520_p2 = scmp.lt.s32.totalorder %s59_s12, %s59_s12 }
  0x25   :  { %p516_p1 = scmp.ne.s32.totalorder %s59_s12, %s515_s0  ;;  %p521_p3 = scmp.lt.s32.totalorder %s515_s0, %s515_s0 }
  0x27   :  { %p522_p4 = por %p521_p3, %p520_p2 }
  0x29   :  { %p523_p5 = pnand %p522_p4, %p516_p1 }
  0x2b   :  { %526 = shalt.err (!%p523_p5)
}
  0x2c   :  { %64 = dma.hbm_to_vmem [thread:$0]  %s698_s3, 512, %s59_s12, [#allocation9], %s599_s26, %s599_s26, %s600_s27  }
  0x2d   :  { %587 = dma.done.wait [#allocation3], 256  }
  0x2e   :  { %588 = vsyncadd [#allocation3], 4294967040 }
  0x2f   :  { %589 = dma.done.wait [#allocation6], 1024  }
  0x30   :  { %590 = vsyncadd [#allocation6], 4294966272 }
  0x31   :  { %591 = dma.done.wait [#allocation9], 512  }
  0x32   :  { %592 = vsyncadd [#allocation9], 4294966784  ;;  %v82_v0 = vld [vmem:[#allocation5 + $0x18] sm:$0xff]  ;;  %v81_v1 = vld [vmem:[#allocation5 + $0x10] sm:$0xff]  ;;  %vm83_vm0 = vcmask 261120   ;;  %vm167_vm1 = vcmask 521216  }
  0x33   :  { %405 = vmatprep.subr.mxu0 %v82_v0  ;;  %v172_v2 = vld [vmem:[#allocation7 + $0x18] sm:$0xff]  ;;  %v77_v3 = vld [vmem:[#allocation2] sm:$0xff]  ;;  %v80_v4 = vld [vmem:[#allocation5 + $0x8] sm:$0xff]  ;;  %s603_s2 = smov [#allocation10]   ;;  %vm165_vm2 = vcmask 523264   ;;  %s604_s17 = smov [#allocation11]  }
  0x34   :  { %406 = vmatpush3.msra.mxu0 %v82_v0  ;;  %416 = vmatprep.subr.mxu1 %v172_v2  ;;  %v171_v5 = vld [vmem:[#allocation7 + $0x10] sm:$0xff]  ;;  %v79_v6 = vld [vmem:[#allocation5] sm:$0xff]  ;;  %v170_v7 = vld [vmem:[#allocation7 + $0x8] sm:$0xff]  ;;  %s336_s3 = sshll.u32 %s603_s2, 4  ;;  %s348_s18 = sshll.u32 %s604_s17, 4  ;;  %s337_s3 = int_to_ptr.vmem [resolvable:$true] %s336_s3  ;;  %s349_s18 = int_to_ptr.vmem [resolvable:$true] %s348_s18 }
  0x35   :  { %407 = vmatprep.subr.mxu0 %v81_v1  ;;  %417 = vmatpush3.msra.mxu1 %v172_v2  ;;  %v78_v8 = vld [vmem:[#allocation2 + $0x8] sm:$0x3f]  ;;  %v169_v10 = vld [vmem:[#allocation7] sm:$0xff]  ;;  %v252_v11 = vld [vmem:[#allocation8 + $0x10] sm:$0xff]  ;;  %s527_s19 = scalar_lea.vmem %s337_s3, 256  ;;  %p532_p7 = scmp.lt.s32.totalorder %s337_s3, %s337_s3 }
  0x36   :  { %408 = vmatpush3.msra.mxu0 %v81_v1  ;;  %413 = vmatprep.mubr.msk.f32.mxu0 %vm83_vm0, %v77_v3  ;;  %v253_v9 = vld [vmem:[#allocation8 + $0x18] sm:$0xff]  ;;  %v251_v12 = vld [vmem:[#allocation8 + $0x8] sm:$0xff]  ;;  %v250_v13 = vld [vmem:[#allocation8] sm:$0xff]  ;;  %p528_p6 = scmp.ne.s32.totalorder %s337_s3, %s527_s19  ;;  %p533_p8 = scmp.lt.s32.totalorder %s527_s19, %s527_s19 }
  0x37   :  { %409 = vmatprep.subr.mxu0 %v80_v4  ;;  %418 = vmatprep.subr.mxu1 %v171_v5 }
  0x38   :  { %410 = vmatpush3.msra.mxu0 %v80_v4  ;;  %419 = vmatpush3.msra.mxu1 %v171_v5  ;;  %p534_p9 = por %p533_p8, %p532_p7 }
  0x39   :  { %411 = vmatprep.subr.mxu0 %v79_v6  ;;  %420 = vmatprep.subr.mxu1 %v170_v7 }
  0x3a   :  { %412 = vmatpush3.msra.mxu0 %v79_v6  ;;  %421 = vmatpush3.msra.mxu1 %v170_v7  ;;  %p535_p10 = pnand %p534_p9, %p528_p6 }
  0x3b   :  { %414 = vmatmul.mubr.msk.f32.vlgmr.msra.gmra.mxu0 %vm83_vm0, %v78_v8  ;;  %427 = vmatprep.subr.mxu0 %v253_v9 }
  0x3c   :  { %428 = vmatpush3.msra.mxu0 %v253_v9  ;;  %422 = vmatprep.subr.mxu1 %v169_v10 }
  0x3d   :  { %429 = vmatprep.subr.mxu0 %v252_v11  ;;  %423 = vmatpush3.msra.mxu1 %v169_v10 }
  0x3e   :  { %430 = vmatpush3.msra.mxu0 %v252_v11  ;;  %424 = vmatprep.mubr.msk.f32.mxu1 %vm83_vm0, %v77_v3 }
  0x3f   :  { %431 = vmatprep.subr.mxu0 %v251_v12  ;;  %425 = vmatmul.mubr.msk.f32.vlgmr.msra.gmra.mxu1 %vm83_vm0, %v78_v8 }
  0x40   :  { %432 = vmatpush3.msra.mxu0 %v251_v12  ;;  %435 = vmatprep.mubr.msk.f32.mxu0 %vm83_vm0, %v77_v3 }
  0x41   :  { %433 = vmatprep.subr.mxu0 %v250_v13 }
  0x42   :  { %434 = vmatpush3.msra.mxu0 %v250_v13 }
  0x43   :  { %436 = vmatmul.mubr.msk.f32.vlgmr.msra.gmra.mxu0 %vm83_vm0, %v78_v8 }
  0xfb   :  { %v415_v14 = vpop.f32.mrf.mxu0 }
  0xfc   :  { %168 = vst.msk [vmem:[#allocation10 + $0x8] sm:$0x3f] %vm167_vm1, %v415_v14 }
  0xfd   :  { %v156_v15 = vpop.f32.mrf.mxu0 }
  0xfe   :  { %166 = vst.msk [vmem:[#allocation10] sm:$0xff] %vm165_vm2, %v156_v15 }
  0xff   :  { %v426_v16 = vpop.f32.mrf.mxu1 }
 0x100   :  { %538 = shalt.err (!%p535_p10)
}
 0x101   :  { %342 = dma.vmem_to_hbm [thread:$0]  %s337_s3, 256, %s699_s4, [#allocation4], %s599_s26, %s599_s26, %s600_s27   ;;  %249 = vst.msk [vmem:[#allocation11 + $0x8] sm:$0x3f] %vm167_vm1, %v426_v16  ;;  %v239_v17 = vpop.f32.mrf.mxu1 }
 0x102   :  { %s605_s22 = smov [#allocation13]   ;;  %248 = vst.msk [vmem:[#allocation11] sm:$0xff] %vm165_vm2, %v239_v17  ;;  %s547_s24 = scalar_lea.vmem %s349_s18, 256 }
 0x103   :  { %s360_s23 = sshll.u32 %s605_s22, 4  ;;  %v437_v18 = vpop.f32.mrf.mxu0  ;;  %p548_p11 = scmp.ne.s32.totalorder %s349_s18, %s547_s24  ;;  %s361_s23 = int_to_ptr.vmem [resolvable:$true] %s360_s23 }
 0x104   :  { %p552_p12 = scmp.lt.s32.totalorder %s349_s18, %s349_s18  ;;  %p553_p13 = scmp.lt.s32.totalorder %s547_s24, %s547_s24 }
 0x106   :  { %p554_p0 = por %p553_p13, %p552_p12 }
 0x108   :  { %p555_p1 = pnand %p554_p0, %p548_p11 }
 0x10a   :  { %558 = shalt.err (!%p555_p1)
}
 0x10b   :  { %354 = dma.vmem_to_hbm [thread:$0]  %s349_s18, 256, %s700_s5, [#allocation12], %s599_s26, %s599_s26, %s600_s27   ;;  %330 = vst.msk [vmem:[#allocation13 + $0x8] sm:$0x3f] %vm167_vm1, %v437_v18  ;;  %v320_v19 = vpop.f32.mrf.mxu0 }
 0x10c   :  { %329 = vst.msk [vmem:[#allocation13] sm:$0xff] %vm165_vm2, %v320_v19  ;;  %s567_s28 = scalar_lea.vmem %s361_s23, 256  ;;  %p572_p3 = scmp.lt.s32.totalorder %s361_s23, %s361_s23 }
 0x10d   :  { %p568_p2 = scmp.ne.s32.totalorder %s361_s23, %s567_s28  ;;  %p573_p4 = scmp.lt.s32.totalorder %s567_s28, %s567_s28 }
 0x10f   :  { %p574_p5 = por %p573_p4, %p572_p3 }
 0x111   :  { %p575_p6 = pnand %p574_p5, %p568_p2 }
 0x113   :  { %578 = shalt.err (!%p575_p6)
}
 0x114   :  { %366 = dma.vmem_to_hbm [thread:$0]  %s361_s23, 256, %s701_s6, [#allocation12], %s599_s26, %s599_s26, %s600_s27  }
 0x115   :  { %593 = dma.done.wait [#allocation4], 256  }
 0x116   :  { %594 = vsyncadd [#allocation4], 4294967040 }
 0x117   :  { %595 = dma.done.wait [#allocation12], 512  }
 0x118   :  { %596 = vsyncadd [#allocation12], 4294966784 }
 0x119   :  { %376 = vsyncpa [#allocation3], 1 }
 0x11a   :  { %377 = vsyncpa [#allocation6], 1 }
 0x11b   :  { %378 = vsyncpa [#allocation9], 1 }
 0x11c   :  { %379 = vsyncpa [#allocation4], 1 }
 0x11d   :  { %380 = vsyncpa [#allocation12], 1 }

</bundles_post_ra>
